<compile_context>
chip_gen: v7x
topology: tpu7x:2x2x1
jax: 0.10.0
libtpu: 0.0.40
codegen_flags: <defaults>
</compile_context>

<pallas_src>
import jax
import jax.numpy as jnp
from jax.experimental import pallas as pl
from jax.experimental.pallas import tpu as pltpu


_LANES = 128


def _vmem_capacity_bytes():
    """Best-effort physical VMEM per TensorCore; conservative fallback."""
    try:
        cap = getattr(pltpu.get_tpu_info(), "vmem_capacity_bytes", None)
        if cap:
            return int(cap)
    except Exception:
        pass
    return 64 * 1024 * 1024  # v7x has the smallest VMEM of current chips


def _num_tensorcores():
    """Best-effort TensorCores per chip (1 on v5e/v6e, 2 on v7x/megacore)."""
    try:
        info = pltpu.get_tpu_info()
        for name in ("num_tensorcores", "tensorcores_per_chip", "num_cores"):
            val = getattr(info, name, None)
            if val:
                return max(1, int(val))
    except Exception:
        pass
    try:
        kind = jax.devices()[0].device_kind.lower()
    except Exception:
        return 1
    if "lite" in kind or "v5e" in kind or "v6" in kind:
        return 1
    if "v7" in kind or "v4" in kind or "v5p" in kind:
        return 2
    return 1


def _make_dice_sums_kernel(*, tile_s, k_per_par, n_chunks, n_feat, needs_mask):
    """Builds the per-chunk partial-sum kernel (all sizes are Python statics)."""

    def kernel(p_ref, t_ref, inter_ref, denom_ref):
        # Grid = (core split, feature chunks).  The output blocks are indexed
        # only by the first (parallel) axis, so they stay resident in VMEM
        # across the feature (reduction) axis and act as accumulators.
        k = pl.program_id(1)

        @pl.when(k == 0)
        def _():
            inter_ref[...] = jnp.zeros_like(inter_ref)
            denom_ref[...] = jnp.zeros_like(denom_ref)

        x = p_ref[...].astype(jnp.float32)                    # (B, tile_s, 128)
        t = t_ref[...].astype(jnp.float32)
        # sigmoid(x) == 0.5 * tanh(0.5 * x) + 0.5 : one EUP push per element
        # (vs. exp + divide), so v7x stays HBM-bound instead of EUP-bound.
        p = 0.5 * jnp.tanh(0.5 * x) + 0.5

        pt = p * t
        pd = p + t

        if not needs_mask:
            # Everything is tile-aligned: plain lane-wide partial sums.
            inter_ref[...] += jnp.sum(pt, axis=1)             # (B, 128)
            denom_ref[...] += jnp.sum(pd, axis=1)
        else:
            chunk = pl.program_id(0) * k_per_par + k          # global chunk id

            @pl.when(chunk < n_chunks - 1)
            def _():
                inter_ref[...] += jnp.sum(pt, axis=1)
                denom_ref[...] += jnp.sum(pd, axis=1)

            @pl.when(chunk >= n_chunks - 1)
            def _():
                # Valid flat-feature elements remaining from this chunk's
                # start (<= 0 for a duplicated chunk -> fully masked).
                rem = n_feat - chunk * (tile_s * _LANES)
                row = jax.lax.broadcasted_iota(jnp.int32, (1, tile_s, _LANES), 1)
                lane = jax.lax.broadcasted_iota(jnp.int32, (1, tile_s, _LANES), 2)
                valid = row * _LANES + lane < rem
                # Use a select (jnp.where), not multiply-by-mask: out-of-bounds
                # rows of the last block may hold uninitialized VMEM (NaN/Inf),
                # and NaN * 0 would still poison the sum.
                inter_ref[...] += jnp.sum(jnp.where(valid, pt, 0.0), axis=1)
                denom_ref[...] += jnp.sum(jnp.where(valid, pd, 0.0), axis=1)

    return kernel


def dice_loss(preds, targets, smooth=1.0, *, block_bytes=8 * 1024 * 1024,
              num_cores=None):
    """Pallas implementation of DiceLoss.forward.  Returns a float32 scalar."""
    B = preds.shape[0]
    preds2d = preds.reshape(B, -1)
    targets2d = targets.reshape(B, -1)
    N = preds2d.shape[1]

    # ---- pack densely into (B, S, 128) --------------------------------------
    n128 = pl.cdiv(N, _LANES) * _LANES
    if n128 != N:
        # TODO(synk): this pad is a full-array copy; it is only hit when the
        # flattened feature count isn't a multiple of 128 (the in-kernel tail
        # mask makes the pad value irrelevant, so pad with zeros).
        preds2d = jnp.pad(preds2d, ((0, 0), (0, n128 - N)))
        targets2d = jnp.pad(targets2d, ((0, 0), (0, n128 - N)))
    S = n128 // _LANES
    preds3d = preds2d.reshape(B, S, _LANES)
    targets3d = targets2d.reshape(B, S, _LANES)

    # ---- choose tiling -------------------------------------------------------
    p_item = preds.dtype.itemsize
    t_item = targets.dtype.itemsize
    itemsize = max(p_item, t_item)           # true itemsize (no f32 floor)
    tile_s = max(8, (block_bytes // (B * _LANES * itemsize)) // 8 * 8)
    tile_s = min(tile_s, pl.cdiv(S, 8) * 8)

    # VMEM budget: 2 inputs x 2 pipeline buffers + f32 upcast temporaries must
    # fit the chip's scoped VMEM (64 MiB on v7x, 128 MiB on v5e/v6e).
    vmem_cap = _vmem_capacity_bytes()
    budget = min(max(32 * 1024 * 1024, vmem_cap * 3 // 4),
                 vmem_cap - 8 * 1024 * 1024)

    def _working_set(ts):
        blk = B * ts * _LANES
        return 2 * blk * (p_item + t_item) + 4 * blk * 4 + 2 * 1024 * 1024

    while tile_s > 8 and _working_set(tile_s) > budget:
        tile_s -= 8

    n_chunks = pl.cdiv(S, tile_s)
    n_par = num_cores if num_cores is not None else _num_tensorcores()
    n_par = max(1, min(int(n_par), n_chunks))
    k_per_par = pl.cdiv(n_chunks, n_par)
    n_total = n_par * k_per_par               # may exceed n_chunks by < n_par
    needs_mask = (n_total * tile_s * _LANES) != N

    def in_map(c, k):
        chunk = c * k_per_par + k
        if n_total != n_chunks:
            # Duplicated chunks (from the per-core round-up) re-read the last
            # real chunk; their contribution is fully masked in the kernel.
            chunk = jnp.minimum(chunk, n_chunks - 1)
        return (0, chunk, 0)

    out_map = lambda c, k: (c, 0, 0)

    kernel = _make_dice_sums_kernel(
        tile_s=tile_s, k_per_par=k_per_par, n_chunks=n_chunks,
        n_feat=N, needs_mask=needs_mask)

    inter_parts, denom_parts = pl.pallas_call(
        kernel,
        out_shape=(
            jax.ShapeDtypeStruct((n_par, B, _LANES), jnp.float32),
            jax.ShapeDtypeStruct((n_par, B, _LANES), jnp.float32),
        ),
        grid_spec=pltpu.PrefetchScalarGridSpec(
            num_scalar_prefetch=0,
            grid=(n_par, k_per_par),
            in_specs=[
                pl.BlockSpec((B, tile_s, _LANES), in_map),
                pl.BlockSpec((B, tile_s, _LANES), in_map),
            ],
            out_specs=[
                pl.BlockSpec((None, B, _LANES), out_map),
                pl.BlockSpec((None, B, _LANES), out_map),
            ],
        ),
        compiler_params=pltpu.CompilerParams(
            dimension_semantics=("parallel", "arbitrary"),
            vmem_limit_bytes=int(budget),
        ),
    )(preds3d, targets3d)

    # Tiny epilogue in plain JAX: collapse cores + lanes, then dice + mean.
    inter = jnp.sum(inter_parts, axis=(0, 2))          # (B,)
    denom = jnp.sum(denom_parts, axis=(0, 2))          # (B,) == sum(p) + sum(t)
    dice = (2.0 * inter + smooth) / (denom + smooth)
    return 1.0 - jnp.mean(dice)


if __name__ == "__main__":
    key = jax.random.PRNGKey(0)
    k1, k2, k3, k4, k5, k6 = jax.random.split(key, 6)

    def ref_dice(preds, targets, smooth=1.0):
        b = preds.shape[0]
        p = jax.nn.sigmoid(preds.astype(jnp.float32)).reshape(b, -1)
        t = targets.astype(jnp.float32).reshape(b, -1)
        inter = jnp.sum(p * t, axis=1)
        dice = (2.0 * inter + smooth) / (jnp.sum(p, axis=1) + jnp.sum(t, axis=1) + smooth)
        return 1.0 - jnp.mean(dice)

    # Case 1: lane-aligned feature count (no pad, no tail mask), default tiling.
    B, C, H, W = 2, 4, 16, 16
    preds = jax.random.normal(k1, (B, C, H, W), dtype=jnp.float32)
    targets = (jax.random.uniform(k2, (B, C, H, W)) > 0.5).astype(jnp.float32)
    loss = jax.jit(dice_loss)(preds, targets)
    jax.block_until_ready(loss)
    ref = ref_dice(preds, targets)
    assert jnp.allclose(loss, ref, atol=1e-5, rtol=1e-5), (float(loss), float(ref))

    # Case 2: ragged feature count + 2 feature chunks (exercises the tail mask).
    B2, C2, H2, W2 = 2, 4, 33, 9          # N = 1188, not a multiple of 128
    preds2 = jax.random.normal(k3, (B2, C2, H2, W2), dtype=jnp.float32)
    targets2 = (jax.random.uniform(k4, (B2, C2, H2, W2)) > 0.5).astype(jnp.float32)
    loss2 = jax.jit(lambda p, t: dice_loss(p, t, block_bytes=8 * 1024))(preds2, targets2)
    jax.block_until_ready(loss2)
    ref2 = ref_dice(preds2, targets2)
    assert jnp.allclose(loss2, ref2, atol=1e-5, rtol=1e-5), (float(loss2), float(ref2))

    # Case 3: odd chunk count with a forced 2-way core split (exercises the
    # clamped, fully-masked duplicate chunk; valid on any chip generation).
    B3, C3, H3, W3 = 2, 4, 55, 10         # N = 2200 -> 3 chunks of 8 rows
    preds3 = jax.random.normal(k5, (B3, C3, H3, W3), dtype=jnp.float32)
    targets3 = (jax.random.uniform(k6, (B3, C3, H3, W3)) > 0.5).astype(jnp.float32)
    loss3 = jax.jit(lambda p, t: dice_loss(p, t, block_bytes=8 * 1024,
                                           num_cores=2))(preds3, targets3)
    jax.block_until_ready(loss3)
    ref3 = ref_dice(preds3, targets3)
    assert jnp.allclose(loss3, ref3, atol=1e-5, rtol=1e-5), (float(loss3), float(ref3))

    print("KERNEL_OK")
</pallas_src>

<mosaic_0001>
module attributes {stable_mosaic.version = 11 : i64} {
  func.func @kernel(%arg0: i32, %arg1: i32, %arg2: memref<2x8x128xf32, #tpu.memory_space<vmem>>, %arg3: memref<2x8x128xf32, #tpu.memory_space<vmem>>, %arg4: memref<1x2x128xf32, #tpu.memory_space<vmem>>, %arg5: memref<1x2x128xf32, #tpu.memory_space<vmem>>) attributes {dimension_semantics = [#tpu.dimension_semantics<parallel>, #tpu.dimension_semantics<arbitrary>], iteration_bounds = array<i64: 1, 1>, scalar_prefetch = 0 : i64, scratch_operands = 0 : i64, tpu.core_type = #tpu.core_type<tc>, window_params = [{transform_indices = @transform_0, window_bounds = array<i64: 2, 8, 128>}, {transform_indices = @transform_1, window_bounds = array<i64: 2, 8, 128>}, {transform_indices = @transform_2, window_bounds = array<i64: 1, 2, 128>}, {transform_indices = @transform_3, window_bounds = array<i64: 1, 2, 128>}]} {
    %c0_i32 = arith.constant 0 : i32
    %0 = arith.cmpi eq, %arg1, %c0_i32 : i32
    %1 = arith.extui %0 : i1 to i32
    %c0_i32_0 = arith.constant 0 : i32
    %2 = arith.cmpi ne, %1, %c0_i32_0 : i32
    scf.if %2 {
      %cst_22 = arith.constant 0.000000e+00 : f32
      %28 = vector.broadcast %cst_22 : f32 to vector<2x128xf32>
      %c0_23 = arith.constant 0 : index
      %c0_24 = arith.constant 0 : index
      %c0_25 = arith.constant 0 : index
      %29 = vector.load %arg4[%c0_23, %c0_24, %c0_25] : memref<1x2x128xf32, #tpu.memory_space<vmem>>, vector<1x2x128xf32>
      %30 = vector.shape_cast %29 : vector<1x2x128xf32> to vector<2x128xf32>
      %31 = vector.shape_cast %28 : vector<2x128xf32> to vector<1x2x128xf32>
      tpu.vector_store %arg4[%c0_23, %c0_24, %c0_25], %31 {strides = array<i32>} : memref<1x2x128xf32, #tpu.memory_space<vmem>>, vector<1x2x128xf32>,
      %cst_26 = arith.constant 0.000000e+00 : f32
      %32 = vector.broadcast %cst_26 : f32 to vector<2x128xf32>
      %c0_27 = arith.constant 0 : index
      %c0_28 = arith.constant 0 : index
      %c0_29 = arith.constant 0 : index
      %33 = vector.load %arg5[%c0_27, %c0_28, %c0_29] : memref<1x2x128xf32, #tpu.memory_space<vmem>>, vector<1x2x128xf32>
      %34 = vector.shape_cast %33 : vector<1x2x128xf32> to vector<2x128xf32>
      %35 = vector.shape_cast %32 : vector<2x128xf32> to vector<1x2x128xf32>
      tpu.vector_store %arg5[%c0_27, %c0_28, %c0_29], %35 {strides = array<i32>} : memref<1x2x128xf32, #tpu.memory_space<vmem>>, vector<1x2x128xf32>,
    } else {
    }
    %c0 = arith.constant 0 : index
    %c0_1 = arith.constant 0 : index
    %c0_2 = arith.constant 0 : index
    %3 = vector.load %arg2[%c0, %c0_1, %c0_2] : memref<2x8x128xf32, #tpu.memory_space<vmem>>, vector<2x8x128xf32>
    %c0_3 = arith.constant 0 : index
    %c0_4 = arith.constant 0 : index
    %c0_5 = arith.constant 0 : index
    %4 = vector.load %arg3[%c0_3, %c0_4, %c0_5] : memref<2x8x128xf32, #tpu.memory_space<vmem>>, vector<2x8x128xf32>
    %cst = arith.constant 5.000000e-01 : f32
    %5 = vector.broadcast %cst : f32 to vector<2x8x128xf32>
    %6 = arith.mulf %5, %3 : vector<2x8x128xf32>
    %7 = math.tanh %6 : vector<2x8x128xf32>
    %cst_6 = arith.constant 5.000000e-01 : f32
    %8 = vector.broadcast %cst_6 : f32 to vector<2x8x128xf32>
    %9 = arith.mulf %8, %7 : vector<2x8x128xf32>
    %cst_7 = arith.constant 5.000000e-01 : f32
    %10 = vector.broadcast %cst_7 : f32 to vector<2x8x128xf32>
    %11 = arith.addf %9, %10 : vector<2x8x128xf32>
    %12 = arith.mulf %11, %4 : vector<2x8x128xf32>
    %13 = arith.addf %11, %4 : vector<2x8x128xf32>
    %c0_8 = arith.constant 0 : index
    %c0_9 = arith.constant 0 : index
    %c0_10 = arith.constant 0 : index
    %14 = vector.load %arg4[%c0_8, %c0_9, %c0_10] : memref<1x2x128xf32, #tpu.memory_space<vmem>>, vector<1x2x128xf32>
    %15 = vector.shape_cast %14 : vector<1x2x128xf32> to vector<2x128xf32>
    %cst_11 = arith.constant dense<0.000000e+00> : vector<2x128xf32>
    %16 = vector.multi_reduction <add>, %12, %cst_11 [1] : vector<2x8x128xf32> to vector<2x128xf32>
    %17 = arith.addf %15, %16 : vector<2x128xf32>
    %c0_12 = arith.constant 0 : index
    %c0_13 = arith.constant 0 : index
    %c0_14 = arith.constant 0 : index
    %18 = vector.load %arg4[%c0_12, %c0_13, %c0_14] : memref<1x2x128xf32, #tpu.memory_space<vmem>>, vector<1x2x128xf32>
    %19 = vector.shape_cast %18 : vector<1x2x128xf32> to vector<2x128xf32>
    %20 = vector.shape_cast %17 : vector<2x128xf32> to vector<1x2x128xf32>
    tpu.vector_store %arg4[%c0_12, %c0_13, %c0_14], %20 {strides = array<i32>} : memref<1x2x128xf32, #tpu.memory_space<vmem>>, vector<1x2x128xf32>,
    %c0_15 = arith.constant 0 : index
    %c0_16 = arith.constant 0 : index
    %c0_17 = arith.constant 0 : index
    %21 = vector.load %arg5[%c0_15, %c0_16, %c0_17] : memref<1x2x128xf32, #tpu.memory_space<vmem>>, vector<1x2x128xf32>
    %22 = vector.shape_cast %21 : vector<1x2x128xf32> to vector<2x128xf32>
    %cst_18 = arith.constant dense<0.000000e+00> : vector<2x128xf32>
    %23 = vector.multi_reduction <add>, %13, %cst_18 [1] : vector<2x8x128xf32> to vector<2x128xf32>
    %24 = arith.addf %22, %23 : vector<2x128xf32>
    %c0_19 = arith.constant 0 : index
    %c0_20 = arith.constant 0 : index
    %c0_21 = arith.constant 0 : index
    %25 = vector.load %arg5[%c0_19, %c0_20, %c0_21] : memref<1x2x128xf32, #tpu.memory_space<vmem>>, vector<1x2x128xf32>
    %26 = vector.shape_cast %25 : vector<1x2x128xf32> to vector<2x128xf32>
    %27 = vector.shape_cast %24 : vector<2x128xf32> to vector<1x2x128xf32>
    tpu.vector_store %arg5[%c0_19, %c0_20, %c0_21], %27 {strides = array<i32>} : memref<1x2x128xf32, #tpu.memory_space<vmem>>, vector<1x2x128xf32>,
    return
  }
  func.func @transform_0(%arg0: i32, %arg1: i32) -> (i32, i32, i32) {
    %c1_i32 = arith.constant 1 : i32
    %0 = arith.muli %arg0, %c1_i32 : i32
    %1 = arith.addi %0, %arg1 : i32
    %c0_i32 = arith.constant 0 : i32
    %c0_i32_0 = arith.constant 0 : i32
    %c0_i32_1 = arith.constant 0 : i32
    return %c0_i32, %1, %c0_i32_0 : i32, i32, i32
  }
  func.func @transform_1(%arg0: i32, %arg1: i32) -> (i32, i32, i32) {
    %c1_i32 = arith.constant 1 : i32
    %0 = arith.muli %arg0, %c1_i32 : i32
    %1 = arith.addi %0, %arg1 : i32
    %c0_i32 = arith.constant 0 : i32
    %c0_i32_0 = arith.constant 0 : i32
    %c0_i32_1 = arith.constant 0 : i32
    return %c0_i32, %1, %c0_i32_0 : i32, i32, i32
  }
  func.func @transform_2(%arg0: i32, %arg1: i32) -> (i32, i32, i32) {
    %c0_i32 = arith.constant 0 : i32
    %c0_i32_0 = arith.constant 0 : i32
    %c0_i32_1 = arith.constant 0 : i32
    return %arg0, %c0_i32, %c0_i32_0 : i32, i32, i32
  }
  func.func @transform_3(%arg0: i32, %arg1: i32) -> (i32, i32, i32) {
    %c0_i32 = arith.constant 0 : i32
    %c0_i32_0 = arith.constant 0 : i32
    %c0_i32_1 = arith.constant 0 : i32
    return %arg0, %c0_i32, %c0_i32_0 : i32, i32, i32
  }
}

</mosaic_0001>

<bundles_post_ra>
// kernel: dice_loss.1
= control target key start
LH: loop header
LB: loop body
LE: loop exit
PB: predicated region body
PF: predicated region fallthrough
CT: control target
= control target key end

     0   :  { %v133_v0 = vmov 0.0   ;;  %vm84_vm0 = vcmask 1041409   ;;  %s184_s2 = inlined_call_operand.vmem [shape: f32[1,2,128], index: 2, kind: output, shape index: {0}]   ;;  %s185_s3 = inlined_call_operand.vmem [shape: f32[1,2,128], index: 3, kind: output, shape index: {1}]   ;;  %s186_s0 = inlined_call_operand.vmem [shape: f32[2,8,128], index: 0, kind: input, shape index: {}]   ;;  %s187_s1 = inlined_call_operand.vmem [shape: f32[2,8,128], index: 1, kind: input, shape index: {}]  }
   0x1   :  { %51 = vst [vmem:[%s184_s2] sm:$0x3] %v133_v0  ;;  %52 = vst [vmem:[%s185_s3] sm:$0x3] %v133_v0  ;;  %v53_v1 = vld [vmem:[%s186_s0] sm:$0xff]  ;;  %v54_v2 = vld [vmem:[%s186_s0 + $0x8] sm:$0xff] }
   0x2   :  { %v57_v3 = vmul.f32 0.5, %v53_v1  ;;  %v58_v4 = vmul.f32 0.5, %v54_v2  ;;  %v55_v8 = vld [vmem:[%s187_s1] sm:$0xff]  ;;  %v56_v10 = vld [vmem:[%s187_s1 + $0x8] sm:$0xff] }
   0x4   :  { %129 = vtanh.f32 %v57_v3 }
   0x5   :  { %131 = vtanh.f32 %v58_v4 }
   0x8   :  { %v69_v39 = vld [vmem:[%s184_s2] sm:$0x3] }
   0x9   :  { %v89_v41 = vld [vmem:[%s185_s3] sm:$0x3] }
   0xe   :  { %v130_v5 = vpop.eup %129 }
   0xf   :  { %v132_v6 = vpop.eup %131  ;;  %v61_v7 = vmul.f32 0.5, %v130_v5 }
  0x10   :  { %v62_v9 = vmul.f32 0.5, %v132_v6 }
  0x11   :  { %v63_v11 = vadd.f32 0.5, %v61_v7 }
  0x12   :  { %v64_v12 = vadd.f32 0.5, %v62_v9 }
  0x13   :  { %v65_v13 = vmul.f32 %v63_v11, %v55_v8  ;;  %v67_v14 = vadd.f32 %v63_v11, %v55_v8 }
  0x14   :  { %v66_v15 = vmul.f32 %v64_v12, %v56_v10  ;;  %v68_v16 = vadd.f32 %v64_v12, %v56_v10 }
  0x15   :  { %v70_v17 = vrot.slane %v65_v13, 4  ;;  %v90_v18 = vrot.slane %v67_v14, 4 }
  0x16   :  { %v76_v19 = vrot.slane %v66_v15, 4  ;;  %v96_v20 = vrot.slane %v68_v16, 4 }
  0x17   :  { %v71_v21 = vadd.f32 %v70_v17, %v65_v13  ;;  %v91_v22 = vadd.f32 %v90_v18, %v67_v14 }
  0x18   :  { %v77_v23 = vadd.f32 %v76_v19, %v66_v15  ;;  %v97_v24 = vadd.f32 %v96_v20, %v68_v16 }
  0x19   :  { %v72_v25 = vrot.slane %v71_v21, 2  ;;  %v92_v26 = vrot.slane %v91_v22, 2 }
  0x1a   :  { %v78_v27 = vrot.slane %v77_v23, 2  ;;  %v98_v28 = vrot.slane %v97_v24, 2 }
  0x1b   :  { %v73_v29 = vadd.f32 %v72_v25, %v71_v21  ;;  %v93_v30 = vadd.f32 %v92_v26, %v91_v22 }
  0x1c   :  { %v79_v31 = vadd.f32 %v78_v27, %v77_v23  ;;  %v99_v32 = vadd.f32 %v98_v28, %v97_v24 }
  0x1d   :  { %v74_v33 = vrot.slane %v73_v29, 1  ;;  %v94_v34 = vrot.slane %v93_v30, 1 }
  0x1e   :  { %v80_v35 = vrot.slane %v79_v31, 1  ;;  %v100_v36 = vrot.slane %v99_v32, 1 }
  0x1f   :  { %v75_v37 = vadd.f32 %v74_v33, %v73_v29  ;;  %v95_v38 = vadd.f32 %v94_v34, %v93_v30 }
  0x20   :  { %v81_v40 = vadd.f32 %v80_v35, %v79_v31  ;;  %v101_v42 = vadd.f32 %v100_v36, %v99_v32 }
  0x22   :  { %v85_v43 = vsel %vm84_vm0, %v81_v40, %v75_v37  ;;  %v104_v44 = vsel %vm84_vm0, %v101_v42, %v95_v38 }
  0x23   :  { %v87_v45 = vadd.f32 %v85_v43, %v69_v39  ;;  %v106_v46 = vadd.f32 %v104_v44, %v89_v41 }
  0x25   :  { %88 = vst [vmem:[%s184_s2] sm:$0x3] %v87_v45  ;;  %107 = vst [vmem:[%s185_s3] sm:$0x3] %v106_v46 }

</bundles_post_ra>
